<compile_context>
chip_gen: v6e
topology: v6e:2x2x1
jax: 0.10.0
libtpu: 0.0.40
codegen_flags: <defaults>
</compile_context>

<pallas_src>
import math

import jax
import jax.numpy as jnp
import numpy as np
from jax.experimental import pallas as pl
from jax.experimental.pallas import tpu as pltpu


# -----------------------------------------------------------------------------
# Kernels
# -----------------------------------------------------------------------------
def _encode_kernel(x_ref, w_ref, b_ref, o_ref):
    # Grid: (B tiles, H tiles). Full contraction (2D) resident in VMEM, so there is
    # no reduction grid axis and no accumulator scratch.
    #   x_ref: (tb, 2D)   w_ref: (2D, th)   b_ref: (1, th) f32   o_ref: (tb, th)
    acc = jnp.dot(x_ref[...], w_ref[...], preferred_element_type=jnp.float32)
    o_ref[...] = jnp.maximum(acc + b_ref[...], 0.0).astype(o_ref.dtype)


def _decode_kernel(thr_ref, a_ref, w_ref, b_ref, o_ref):
    # Grid: (B tiles, H reduction tiles); reduction axis last. The (tb, 2D) f32
    # output block is resident across the reduction axis -> accumulate directly
    # into o_ref (no scratch). Batch-top-k is fused via a scalar threshold.
    #   thr_ref: (1,) f32 SMEM   a_ref: (tb, th)   w_ref: (th, 2D)
    #   b_ref: (1, 2D) f32       o_ref: (tb, 2D) f32
    k = pl.program_id(1)

    @pl.when(k == 0)
    def _():
        o_ref[...] = jnp.zeros_like(o_ref)

    a = a_ref[...]
    thr = thr_ref[0].astype(a.dtype)          # bf16 values round-trip exactly
    a = jnp.where(a >= thr, a, jnp.zeros_like(a))
    o_ref[...] += jnp.dot(a, w_ref[...], preferred_element_type=jnp.float32)

    @pl.when(k == pl.num_programs(1) - 1)
    def _():
        o_ref[...] += b_ref[...]


# -----------------------------------------------------------------------------
# Tiling helpers (lane/sublane hardened, VMEM-budget aware)
# -----------------------------------------------------------------------------
def _tile_candidates(dim, multiple):
    """Divisors of `dim` that are multiples of `multiple`, plus `dim` itself
    (a block equal to the full array dim is always layout-legal). Descending."""
    cands = {dim}
    t = multiple
    while t < dim:
        if dim % t == 0:
            cands.add(t)
        t += multiple
    return sorted(cands, reverse=True)


def _largest_le(cands, x):
    for c in cands:
        if c <= x:
            return c
    return cands[-1]


def _next_smaller(cands, cur):
    for c in cands:
        if c < cur:
            return c
    return cur


def _vmem_config():
    """(scoped vmem_limit_bytes, per-step tile budget) derived from the chip:
    v5e/v6e ~128 MiB physical VMEM, v7x ~64 MiB per TensorCore."""
    cap = 64 * 1024 * 1024  # conservative fallback (v7x-sized)
    try:
        cap = int(pltpu.get_tpu_info().vmem_capacity_bytes)
    except Exception:
        pass
    limit = min(int(cap * 0.85), cap - (8 << 20))
    budget = int(limit * 0.90)
    return limit, budget


def _fit_to_budget(est, tb_c, th_c, tb, th, budget):
    """Shrink tiles until est(tb, th) fits; prefer shrinking the feature tile first
    (keeps the batch tile large -> fewer weight re-streams from HBM)."""
    while est(tb, th) > budget:
        th2, tb2 = _next_smaller(th_c, th), _next_smaller(tb_c, tb)
        if th > 256 and th2 < th:
            th = th2
        elif tb > 64 and tb2 < tb:
            tb = tb2
        elif th2 < th:
            th = th2
        elif tb2 < tb:
            tb = tb2
        else:
            break
    return tb, th


def _encode_tiles(B, K, H, in_bytes, out_bytes, budget, tb0, th0):
    tb_c = _tile_candidates(B, 8)
    th_c = _tile_candidates(H, 128)
    tb = _largest_le(tb_c, tb0)
    th = _largest_le(th_c, th0)

    def est(tb_, th_):  # double-buffered input/output blocks
        return 2 * (tb_ * K * in_bytes + K * th_ * in_bytes + th_ * 4
                    + tb_ * th_ * out_bytes)

    tb, th = _fit_to_budget(est, tb_c, th_c, tb, th, budget)

    # v7x megacore: keep >=2 blocks across the two "parallel" axes when possible.
    if (B // tb) * (H // th) < 2:
        th2, tb2 = _next_smaller(th_c, th), _next_smaller(tb_c, tb)
        if th2 < th:
            th = th2
        elif tb2 < tb:
            tb = tb2
    return tb, th


def _decode_tiles(B, H, N, in_bytes, budget, tb0, th0):
    tb_c = _tile_candidates(B, 8)
    th_c = _tile_candidates(H, 128)
    tb = _largest_le(tb_c, tb0)
    th = _largest_le(th_c, th0)

    def est(tb_, th_):
        return 2 * (tb_ * th_ * in_bytes + th_ * N * in_bytes + N * 4
                    + tb_ * N * 4)

    tb, th = _fit_to_budget(est, tb_c, th_c, tb, th, budget)

    # keep >=2 batch blocks for the single "parallel" axis when possible (v7x).
    if B // tb < 2:
        tb2 = _next_smaller(tb_c, tb)
        if tb2 < tb:
            tb = tb2
    return tb, th


# -----------------------------------------------------------------------------
# Wrappers
# -----------------------------------------------------------------------------
def encode_pre_acts(x_flat, w_enc_flat, b_enc_row, *, out_dtype, tb0=512, th0=1024):
    """pre_acts = relu(x @ W_enc + b_enc) -> (B, H) in out_dtype."""
    B, K = x_flat.shape
    H = w_enc_flat.shape[1]
    in_bytes = x_flat.dtype.itemsize
    out_bytes = jnp.dtype(out_dtype).itemsize
    vmem_limit, budget = _vmem_config()
    tb, th = _encode_tiles(B, K, H, in_bytes, out_bytes, budget, tb0, th0)

    cost = pl.CostEstimate(
        flops=2 * B * K * H,
        transcendentals=0,
        bytes_accessed=(B * K * in_bytes
                        + (B // tb) * K * H * w_enc_flat.dtype.itemsize
                        + H * 4 + B * H * out_bytes),
    )
    return pl.pallas_call(
        _encode_kernel,
        out_shape=jax.ShapeDtypeStruct((B, H), out_dtype),
        grid_spec=pltpu.PrefetchScalarGridSpec(
            num_scalar_prefetch=0,
            grid=(B // tb, H // th),
            in_specs=[
                pl.BlockSpec((tb, K), lambda i, j: (i, 0)),
                pl.BlockSpec((K, th), lambda i, j: (0, j)),
                pl.BlockSpec((1, th), lambda i, j: (0, j)),
            ],
            out_specs=pl.BlockSpec((tb, th), lambda i, j: (i, j)),
        ),
        compiler_params=pltpu.CompilerParams(
            dimension_semantics=("parallel", "parallel"),
            vmem_limit_bytes=vmem_limit,
        ),
        cost_estimate=cost,
    )(x_flat, w_enc_flat, b_enc_row)


def decode_acts(thr, pre_acts, w_dec_flat, b_dec_row, *, tb0=512, th0=1024):
    """(where(pre_acts >= thr, pre_acts, 0) @ W_dec) + b_dec -> (B, 2D) float32."""
    B, H = pre_acts.shape
    N = w_dec_flat.shape[1]
    in_bytes = pre_acts.dtype.itemsize
    vmem_limit, budget = _vmem_config()
    tb, th = _decode_tiles(B, H, N, in_bytes, budget, tb0, th0)

    cost = pl.CostEstimate(
        flops=2 * B * H * N,
        transcendentals=0,
        bytes_accessed=(B * H * in_bytes
                        + (B // tb) * H * N * w_dec_flat.dtype.itemsize
                        + N * 4 + B * N * 4),
    )
    return pl.pallas_call(
        _decode_kernel,
        out_shape=jax.ShapeDtypeStruct((B, N), jnp.float32),
        grid_spec=pltpu.PrefetchScalarGridSpec(
            num_scalar_prefetch=0,
            grid=(B // tb, H // th),
            in_specs=[
                pl.BlockSpec(memory_space=pltpu.MemorySpace.SMEM),   # threshold (1,)
                pl.BlockSpec((tb, th), lambda i, k: (i, k)),
                pl.BlockSpec((th, N), lambda i, k: (k, 0)),
                pl.BlockSpec((1, N), lambda i, k: (0, 0)),
            ],
            out_specs=pl.BlockSpec((tb, N), lambda i, k: (i, 0)),
        ),
        compiler_params=pltpu.CompilerParams(
            dimension_semantics=("parallel", "arbitrary"),
            vmem_limit_bytes=vmem_limit,
        ),
        cost_estimate=cost,
    )(thr, pre_acts, w_dec_flat, b_dec_row)


def batch_topk_threshold(pre_acts, k):
    """Value of the (k*B)-th largest activation over the flattened (B, H) batch.

    Selecting with `pre >= thr` in the decode kernel reproduces the batch-wide
    top-(k*B) mask exactly up to ties at the threshold (ties may admit extra
    features; zeros at a zero threshold contribute nothing post-relu).
    # TODO(synk): replace the full jax.lax.top_k over B*H elements with a
    # two-stage / histogram threshold search for very large B*H.
    """
    B, H = pre_acts.shape
    k_total = min(k * B, B * H)
    flat = pre_acts.reshape(-1).astype(jnp.float32)
    vals = jax.lax.top_k(flat, k_total)[0]
    return vals[k_total - 1].reshape(1)


def crosscoder_forward(x_B2D, kparams, k):
    """CrossCoder.forward(x, inference=False). `kparams` from prepare_params()."""
    B, n_models, D = x_B2D.shape
    compute_dtype = kparams["W_enc_flat"].dtype
    x_flat = x_B2D.reshape(B, n_models * D).astype(compute_dtype)

    pre_acts = encode_pre_acts(x_flat, kparams["W_enc_flat"], kparams["b_enc_row"],
                               out_dtype=compute_dtype)                # (B, H)
    thr = batch_topk_threshold(pre_acts, k)                            # (1,) f32
    recon_flat = decode_acts(thr, pre_acts, kparams["W_dec_flat"],
                             kparams["b_dec_row"])                     # (B, 2D) f32
    return recon_flat.reshape(B, n_models, D)


# -----------------------------------------------------------------------------
# Parameters (mirrors CrossCoder.__init__ semantics) + one-time kernel prep
# -----------------------------------------------------------------------------
def init_params(key, D, H, dec_init_norm=0.08, dtype=jnp.float32):
    # kaiming_uniform_ on (H, 2, D): fan_in = 2*D, gain = sqrt(2)
    fan_in = 2 * D
    bound = math.sqrt(2.0) * math.sqrt(3.0 / fan_in)
    W_dec_H2D = jax.random.uniform(key, (H, 2, D), dtype=dtype,
                                   minval=-bound, maxval=bound)
    W_dec_H2D = W_dec_H2D / jnp.linalg.norm(W_dec_H2D, axis=-1, keepdims=True) * dec_init_norm
    W_enc_2DH = jnp.transpose(W_dec_H2D, (1, 2, 0))  # (2, D, H)
    return {
        "W_dec_H2D": W_dec_H2D,
        "W_enc_2DH": W_enc_2DH,
        "b_enc": jnp.zeros((H,), dtype=dtype),
        "b_dec_2D": jnp.zeros((2, D), dtype=dtype),
    }


def prepare_params(params, compute_dtype=jnp.float32):
    """One-time cast/reshape of weights into the kernel streaming layout + dtype
    (avoids a per-forward full-weight HBM cast pass); biases stay f32."""
    n, D, H = params["W_enc_2DH"].shape
    return {
        "W_enc_flat": params["W_enc_2DH"].reshape(n * D, H).astype(compute_dtype),
        "W_dec_flat": params["W_dec_H2D"].reshape(H, n * D).astype(compute_dtype),
        "b_enc_row": params["b_enc"].reshape(1, H).astype(jnp.float32),
        "b_dec_row": params["b_dec_2D"].reshape(1, n * D).astype(jnp.float32),
    }


# -----------------------------------------------------------------------------
# Pure-JAX reference (original mask-based batch top-k semantics)
# -----------------------------------------------------------------------------
def reference_forward(x_B2D, params, k):
    B = x_B2D.shape[0]
    pre = jnp.einsum("bnd,ndh->bh", x_B2D, params["W_enc_2DH"]) + params["b_enc"]
    pre = jnp.maximum(pre, 0.0)
    k_total = min(k * B, pre.size)
    flat = pre.reshape(-1)
    _, idx = jax.lax.top_k(flat, k_total)
    mask = jnp.zeros_like(flat, dtype=jnp.bool_).at[idx].set(True).reshape(pre.shape)
    acts = pre * mask
    recon = jnp.einsum("bh,hnd->bnd", acts, params["W_dec_H2D"])
    return recon + params["b_dec_2D"][None]


# -----------------------------------------------------------------------------
if __name__ == "__main__":
    # Small TPU-friendly shapes (scaled-down cfg): D=64, H=256, B=8, k=4
    B, D, H, K = 8, 64, 256, 4

    root = jax.random.PRNGKey(0)
    kp, kx, kbe, kbd = jax.random.split(root, 4)
    params = init_params(kp, D, H)
    # Nonzero biases so both bias-add paths are actually exercised.
    params["b_enc"] = 0.02 * jax.random.normal(kbe, (H,), dtype=jnp.float32)
    params["b_dec_2D"] = 0.1 * jax.random.normal(kbd, (2, D), dtype=jnp.float32)
    x_B2D = jax.random.normal(kx, (B, 2, D), dtype=jnp.float32)

    fwd = jax.jit(crosscoder_forward, static_argnames=("k",))

    # float32 path: matches the mask-based reference exactly (no ties at the
    # threshold with continuous random data).
    kparams_f32 = prepare_params(params, jnp.float32)
    out = jax.block_until_ready(fwd(x_B2D, kparams_f32, k=K))
    ref = jax.block_until_ready(reference_forward(x_B2D, params, K))
    np.testing.assert_allclose(np.asarray(out), np.asarray(ref), rtol=1e-4, atol=1e-4)

    # bf16 weight/activation streaming path (f32 MXU accumulation, f32 output):
    # near-tie top-k selection may legitimately differ, so bound the relative
    # reconstruction error against the f32 reference instead of bit-comparing.
    kparams_bf16 = prepare_params(params, jnp.bfloat16)
    out_bf16 = jax.block_until_ready(fwd(x_B2D, kparams_bf16, k=K))
    assert out_bf16.shape == (B, 2, D) and out_bf16.dtype == jnp.float32
    ref_np = np.asarray(ref, dtype=np.float32)
    rel = (np.linalg.norm(np.asarray(out_bf16, dtype=np.float32) - ref_np)
           / (np.linalg.norm(ref_np) + 1e-6))
    assert rel < 0.1, f"bf16 path relative error too large: {rel}"

    print("KERNEL_OK")
</pallas_src>

<mosaic_0001>
module attributes {stable_mosaic.version = 11 : i64} {
  func.func @_encode_kernel(%arg0: i32, %arg1: i32, %arg2: memref<8x128xf32, #tpu.memory_space<vmem>>, %arg3: memref<128x128xf32, #tpu.memory_space<vmem>>, %arg4: memref<1x128xf32, #tpu.memory_space<vmem>>, %arg5: memref<8x128xf32, #tpu.memory_space<vmem>>) attributes {dimension_semantics = [#tpu.dimension_semantics<parallel>, #tpu.dimension_semantics<parallel>], iteration_bounds = array<i64: 1, 2>, scalar_prefetch = 0 : i64, scratch_operands = 0 : i64, tpu.core_type = #tpu.core_type<tc>, window_params = [{transform_indices = @transform_0, window_bounds = array<i64: 8, 128>}, {transform_indices = @transform_1, window_bounds = array<i64: 128, 128>}, {transform_indices = @transform_2, window_bounds = array<i64: 1, 128>}, {transform_indices = @transform_3, window_bounds = array<i64: 8, 128>}]} {
    %c0 = arith.constant 0 : index
    %c0_0 = arith.constant 0 : index
    %0 = vector.load %arg2[%c0, %c0_0] : memref<8x128xf32, #tpu.memory_space<vmem>>, vector<8x128xf32>
    %c0_1 = arith.constant 0 : index
    %c0_2 = arith.constant 0 : index
    %1 = vector.load %arg3[%c0_1, %c0_2] : memref<128x128xf32, #tpu.memory_space<vmem>>, vector<128x128xf32>
    %cst = arith.constant dense<0.000000e+00> : vector<8x128xf32>
    %2 = tpu.matmul %0, %1, %cst {dimension_numbers = #tpu.dot_dimension_numbers<[1], [0], [0], [1], [0, 0, 1, 1], [], []>} : vector<8x128xf32>, vector<128x128xf32>, vector<8x128xf32> -> vector<8x128xf32>
    %c0_3 = arith.constant 0 : index
    %c0_4 = arith.constant 0 : index
    %3 = vector.load %arg4[%c0_3, %c0_4] : memref<1x128xf32, #tpu.memory_space<vmem>>, vector<1x128xf32>
    %4 = vector.broadcast %3 : vector<1x128xf32> to vector<8x128xf32>
    %5 = arith.addf %2, %4 : vector<8x128xf32>
    %cst_5 = arith.constant 0.000000e+00 : f32
    %6 = vector.broadcast %cst_5 : f32 to vector<8x128xf32>
    %7 = arith.maximumf %5, %6 : vector<8x128xf32>
    %c0_6 = arith.constant 0 : index
    %c0_7 = arith.constant 0 : index
    %8 = vector.load %arg5[%c0_6, %c0_7] : memref<8x128xf32, #tpu.memory_space<vmem>>, vector<8x128xf32>
    tpu.vector_store %arg5[%c0_6, %c0_7], %7 {strides = array<i32>} : memref<8x128xf32, #tpu.memory_space<vmem>>, vector<8x128xf32>,
    return
  }
  func.func @transform_0(%arg0: i32, %arg1: i32) -> (i32, i32) {
    %c0_i32 = arith.constant 0 : i32
    %c0_i32_0 = arith.constant 0 : i32
    return %arg0, %c0_i32 : i32, i32
  }
  func.func @transform_1(%arg0: i32, %arg1: i32) -> (i32, i32) {
    %c0_i32 = arith.constant 0 : i32
    %c0_i32_0 = arith.constant 0 : i32
    return %c0_i32, %arg1 : i32, i32
  }
  func.func @transform_2(%arg0: i32, %arg1: i32) -> (i32, i32) {
    %c0_i32 = arith.constant 0 : i32
    %c0_i32_0 = arith.constant 0 : i32
    return %c0_i32, %arg1 : i32, i32
  }
  func.func @transform_3(%arg0: i32, %arg1: i32) -> (i32, i32) {
    %c0_i32 = arith.constant 0 : i32
    return %arg0, %arg1 : i32, i32
  }
}

module attributes {stable_mosaic.version = 11 : i64} {
  func.func @_decode_kernel(%arg0: i32, %arg1: i32, %arg2: memref<1xf32, #tpu.memory_space<smem>>, %arg3: memref<8x256xf32, #tpu.memory_space<vmem>>, %arg4: memref<256x128xf32, #tpu.memory_space<vmem>>, %arg5: memref<1x128xf32, #tpu.memory_space<vmem>>, %arg6: memref<8x128xf32, #tpu.memory_space<vmem>>) attributes {dimension_semantics = [#tpu.dimension_semantics<parallel>, #tpu.dimension_semantics<arbitrary>], iteration_bounds = array<i64: 1, 1>, scalar_prefetch = 0 : i64, scratch_operands = 0 : i64, tpu.core_type = #tpu.core_type<tc>, window_params = [{transform_indices = @transform_0, window_bounds = array<i64: 1>}, {transform_indices = @transform_1, window_bounds = array<i64: 8, 256>}, {transform_indices = @transform_2, window_bounds = array<i64: 256, 128>}, {pipeline_mode = #tpu.pipeline_mode<synchronous>, transform_indices = @transform_3, window_bounds = array<i64: 1, 128>}, {transform_indices = @transform_4, window_bounds = array<i64: 8, 128>}]} {
    %c0_i32 = arith.constant 0 : i32
    %0 = arith.cmpi eq, %arg1, %c0_i32 : i32
    %1 = arith.extui %0 : i1 to i32
    %c0_i32_0 = arith.constant 0 : i32
    %2 = arith.cmpi ne, %1, %c0_i32_0 : i32
    scf.if %2 {
      %cst_12 = arith.constant 0.000000e+00 : f32
      %17 = vector.broadcast %cst_12 : f32 to vector<8x128xf32>
      %c0_13 = arith.constant 0 : index
      %c0_14 = arith.constant 0 : index
      %18 = vector.load %arg6[%c0_13, %c0_14] : memref<8x128xf32, #tpu.memory_space<vmem>>, vector<8x128xf32>
      tpu.vector_store %arg6[%c0_13, %c0_14], %17 {strides = array<i32>} : memref<8x128xf32, #tpu.memory_space<vmem>>, vector<8x128xf32>,
    } else {
    }
    %c0 = arith.constant 0 : index
    %c0_1 = arith.constant 0 : index
    %3 = vector.load %arg3[%c0, %c0_1] : memref<8x256xf32, #tpu.memory_space<vmem>>, vector<8x256xf32>
    %c0_2 = arith.constant 0 : index
    %4 = memref.load %arg2[%c0_2] : memref<1xf32, #tpu.memory_space<smem>>
    %5 = vector.broadcast %4 : f32 to vector<8x256xf32>
    %6 = arith.cmpf oge, %3, %5 : vector<8x256xf32>
    %cst = arith.constant 0.000000e+00 : f32
    %7 = vector.broadcast %cst : f32 to vector<8x256xf32>
    %8 = arith.select %6, %3, %7 : vector<8x256xi1>, vector<8x256xf32>
    %c0_3 = arith.constant 0 : index
    %c0_4 = arith.constant 0 : index
    %9 = vector.load %arg6[%c0_3, %c0_4] : memref<8x128xf32, #tpu.memory_space<vmem>>, vector<8x128xf32>
    %c0_5 = arith.constant 0 : index
    %c0_6 = arith.constant 0 : index
    %10 = vector.load %arg4[%c0_5, %c0_6] : memref<256x128xf32, #tpu.memory_space<vmem>>, vector<256x128xf32>
    %cst_7 = arith.constant dense<0.000000e+00> : vector<8x128xf32>
    %11 = tpu.matmul %8, %10, %cst_7 {dimension_numbers = #tpu.dot_dimension_numbers<[1], [0], [0], [1], [0, 0, 1, 1], [], []>} : vector<8x256xf32>, vector<256x128xf32>, vector<8x128xf32> -> vector<8x128xf32>
    %12 = arith.addf %9, %11 : vector<8x128xf32>
    %c0_8 = arith.constant 0 : index
    %c0_9 = arith.constant 0 : index
    %13 = vector.load %arg6[%c0_8, %c0_9] : memref<8x128xf32, #tpu.memory_space<vmem>>, vector<8x128xf32>
    tpu.vector_store %arg6[%c0_8, %c0_9], %12 {strides = array<i32>} : memref<8x128xf32, #tpu.memory_space<vmem>>, vector<8x128xf32>,
    %c0_i32_10 = arith.constant 0 : i32
    %14 = arith.cmpi eq, %arg1, %c0_i32_10 : i32
    %15 = arith.extui %14 : i1 to i32
    %c0_i32_11 = arith.constant 0 : i32
    %16 = arith.cmpi ne, %15, %c0_i32_11 : i32
    scf.if %16 {
      %c0_12 = arith.constant 0 : index
      %c0_13 = arith.constant 0 : index
      %17 = vector.load %arg6[%c0_12, %c0_13] : memref<8x128xf32, #tpu.memory_space<vmem>>, vector<8x128xf32>
      %c0_14 = arith.constant 0 : index
      %c0_15 = arith.constant 0 : index
      %18 = vector.load %arg5[%c0_14, %c0_15] : memref<1x128xf32, #tpu.memory_space<vmem>>, vector<1x128xf32>
      %19 = vector.broadcast %18 : vector<1x128xf32> to vector<8x128xf32>
      %20 = arith.addf %17, %19 : vector<8x128xf32>
      %c0_16 = arith.constant 0 : index
      %c0_17 = arith.constant 0 : index
      %21 = vector.load %arg6[%c0_16, %c0_17] : memref<8x128xf32, #tpu.memory_space<vmem>>, vector<8x128xf32>
      tpu.vector_store %arg6[%c0_16, %c0_17], %20 {strides = array<i32>} : memref<8x128xf32, #tpu.memory_space<vmem>>, vector<8x128xf32>,
    } else {
    }
    return
  }
  func.func @transform_0(%arg0: i32, %arg1: i32) -> i32 {
    %c0_i32 = arith.constant 0 : i32
    %c0_i32_0 = arith.constant 0 : i32
    return %c0_i32 : i32
  }
  func.func @transform_1(%arg0: i32, %arg1: i32) -> (i32, i32) {
    %c0_i32 = arith.constant 0 : i32
    return %arg0, %arg1 : i32, i32
  }
  func.func @transform_2(%arg0: i32, %arg1: i32) -> (i32, i32) {
    %c0_i32 = arith.constant 0 : i32
    %c0_i32_0 = arith.constant 0 : i32
    return %arg1, %c0_i32 : i32, i32
  }
  func.func @transform_3(%arg0: i32, %arg1: i32) -> (i32, i32) {
    %c0_i32 = arith.constant 0 : i32
    %c0_i32_0 = arith.constant 0 : i32
    %c0_i32_1 = arith.constant 0 : i32
    return %c0_i32, %c0_i32_0 : i32, i32
  }
  func.func @transform_4(%arg0: i32, %arg1: i32) -> (i32, i32) {
    %c0_i32 = arith.constant 0 : i32
    %c0_i32_0 = arith.constant 0 : i32
    return %arg0, %c0_i32 : i32, i32
  }
}

</mosaic_0001>

<bundles_post_ra>
// kernel: crosscoder_forward.2
= control target key start
LH: loop header
LB: loop body
LE: loop exit
PB: predicated region body
PF: predicated region fallthrough
CT: control target
= control target key end

     0   :  { %8 = vsyncpa [#allocation3], 0  ;;  %s803_s0 = inlined_call_operand.vmem [shape: f32[8,128], index: 0, kind: input, shape index: {}]   ;;  %s804_s1 = inlined_call_operand.hbm [shape: f32[128,256], index: 1, kind: input, shape index: {}]   ;;  %s805_s2 = inlined_call_operand.vmem [shape: f32[1,256], index: 2, kind: input, shape index: {}]   ;;  %s806_s3 = inlined_call_operand.vmem [shape: f32[8,256], index: 3, kind: output, shape index: {}]  }
   0x1   :  { %10 = vsyncpa [#allocation3 + $0x1], 0  ;;  %s681_s12 = smov 0   ;;  %s683_s13 = smov 0  }
   0x2   :  { %s685_s14 = smov 0   ;;  %s687_s15 = smov 0  }
   0x3   :  { %s689_s16 = smov 0   ;;  %s691_s17 = smov 0  }
   0x4 LB: > { %s450_s18 = sadd.s32 4294967295, %s653_s17   ;;  %s25_s19 = sadd.s32 1, %s649_s16  ;;  %s653_s17 = sphi %s691_s17, %s16_s17   ;;  %s649_s16 = sphi %s689_s16, %s814_s16   ;;  %s645_s15 = sphi %s687_s15, %s813_s15   ;;  %s641_s14 = sphi %s685_s14, %s812_s14   ;;  %s637_s13 = sphi %s683_s13, %s811_s13   ;;  %s633_s12 = sphi %s681_s12, %s810_s12  }
   0x5   : > { %p26_p0 = scmp.ge.s32.totalorder %s25_s19, 2  ;;  %s61_s20 = sadd.s32 1, %s641_s14 }
   0x6   : > { %p68_p1 = scmp.ne.s32.totalorder %s641_s14, %s637_s13  ;;  %p69_p2 = scmp.eq.s32.totalorder %s653_s17, 0 }
   0x7   : > { %s816_s19 = smov (%p26_p0, %s25_s19), 0  ;;  %p74_p4 = scmp.ne.s32.totalorder %s637_s13, %s633_s12 }
   0x8   : > { %p717_p3 = por %p69_p2, %p68_p1  ;;  %s58_s22 = ssub.s32 %s649_s16, %s816_s19 }
   0x9   : > { %p75_p5 = scmp.eq.s32.totalorder %s450_s18, 0  ;;  %p59_p6 = scmp.eq.s32.totalorder %s58_s22, 0 }
   0xa   : > { %p521_p8 = scmp.lt.s32.totalorder %s653_s17, 2  ;;  %s159_s25 = sand.u32 1, %s641_s14  }
   0xb   : > { %p724_p7 = por %p75_p5, %p74_p4  ;;  %s456_s26 = sshll.u32 %s649_s16, 7 }
   0xc   : > { %s730_s24 = scalar_select %p59_p6, %s641_s14, %s61_s20  }
   0xd   : > { %s455_s27 = sshll.u32 %s159_s25, 7  ;;  %s168_s30 = scalar_lea.hbm %s804_s1, %s456_s26 }
   0xe   : > { %s163_s4 = scalar_lea.vmem [#allocation2], %s455_s27  ;;  %p739_p9 = pnand %p521_p8, %p717_p3 }
   0xf   : > { %s169_s5 = sshll.u32 %s163_s4, 4  ;;  %p457_p10 = scmp.ge.s32.totalorder %s653_s17, 1  ;;  %s170_s5 = int_to_ptr.vmem [resolvable:$true] %s169_s5 }
  0x10   : > { %s160_s7 = scalar_lea.sflag [#allocation3], %s159_s25  ;;  %p577_p11 = pneg %p739_p9 }
  0x11   : > { %s588_s8 = scalar_lea.vmem %s170_s5, 2048  ;;  %s655_s9 = smov [#allocation2]  }
  0x12   : > { %p589_p12 = scmp.ne.s32.totalorder %s170_s5, %s588_s8  ;;  %s593_s10 = sshll.u32 %s655_s9, 4  ;;  %s594_s10 = int_to_ptr.vmem [resolvable:$false] %s593_s10 }
  0x13   : > { %s595_s11 = scalar_lea.vmem %s594_s10, 4096  ;;  %p596_p1 = scmp.lt.s32.totalorder %s170_s5, %s594_s10 }
  0x14   : > { %p591_p13 = pnand %p589_p12, %p577_p11  ;;  %p597_p2 = scmp.lt.s32.totalorder %s595_s11, %s588_s8 }
  0x16   : > { %p592_p0 = pneg %p591_p13  ;;  %p598_p3 = por %p597_p2, %p596_p1 }
  0x18   : > { %p599_p4 = pnand %p598_p3, %p592_p0 }
  0x1a   : > { %602 = shalt.err (!%p599_p4)
}
  0x1b   : > { %s656_s12 = smov 256   ;;  %s657_s18 = smov 128  }
  0x1c   : > { %s658_s20 = smov 8   ;;  %p183_p5 = scmp.lt.s32.totalorder %s653_s17, 3 }
  0x1d   : > { %520 = dma.hbm_to_vmem [thread:$0]  (!%p739_p9), %s168_s30, 2048, %s170_s5, %s160_s7, %s656_s12, %s657_s18, %s658_s20  }
  0x1e   : > { %p184_p6 = pnand %p457_p10, %p183_p5 }
  0x1f   : > { %s189_s21 = sand.u32 (!%p184_p6), 1, %s637_s13  }
  0x20   : > { %187 = sbr.rel (%p184_p6) target bundleno = 269 (0x10d), region = 32  ;;  %s458_s22 = sshll.u32 (!%p184_p6), %s189_s21, 7 }
  0x21   : > { %s190_s25 = scalar_lea.sflag (!%p184_p6), [#allocation3], %s189_s21  ;;  %s752_s26 = scalar_lea.vmem (!%p184_p6), [#allocation2], %s458_s22 }
  0x25   : > { %628 = dma.done.wait (%p724_p7), %s190_s25, 2048  }
  0x26   : > { %630 = vsyncadd (%p724_p7), %s190_s25, 4294965248  ;;  %v659_v0 = vmov 0.0   ;;  %vm660_vm0 = vmmov 0   ;;  %v257_v1 = vld [vmem:[%s752_s26 + $0x78] sm:$0xff]  ;;  %v256_v2 = vld [vmem:[%s752_s26 + $0x70] sm:$0xff]  ;;  %p230_p7 = scmp.lt.s32.totalorder %s645_s15, 1 }
  0x27   : > { %480 = vmatprep.subr.mxu0 %v659_v0  ;;  %512 = vmatprep.mubr.msk.f32.mxu0 %vm660_vm0, %v659_v0  ;;  %v255_v3 = vld [vmem:[%s752_s26 + $0x68] sm:$0xff]  ;;  %v254_v4 = vld [vmem:[%s752_s26 + $0x60] sm:$0xff]  ;;  %v253_v5 = vld [vmem:[%s752_s26 + $0x58] sm:$0xff] }
  0x28   : > { %481 = vmatpush3.msra.mxu0 %v257_v1  ;;  %v252_v6 = vld [vmem:[%s752_s26 + $0x50] sm:$0xff]  ;;  %v251_v7 = vld [vmem:[%s752_s26 + $0x48] sm:$0xff]  ;;  %v250_v8 = vld [vmem:[%s752_s26 + $0x40] sm:$0xff]  ;;  %s818_s15 = smov (!%p230_p7, %s645_s15), 1 }
  0x29   : > { %482 = vmatprep.subr.mxu0 %v659_v0  ;;  %v249_v9 = vld [vmem:[%s752_s26 + $0x38] sm:$0xff]  ;;  %v248_v10 = vld [vmem:[%s752_s26 + $0x30] sm:$0xff]  ;;  %v247_v11 = vld [vmem:[%s752_s26 + $0x28] sm:$0xff]  ;;  %s232_s30 = scalar_lea.vmem %s805_s2, %s818_s15  ;;  %s459_s4 = sshll.u32 %s818_s15, 3 }
  0x2a   : > { %483 = vmatpush3.msra.mxu0 %v256_v2  ;;  %v246_v12 = vld [vmem:[%s752_s26 + $0x20] sm:$0xff]  ;;  %v245_v13 = vld [vmem:[%s752_s26 + $0x18] sm:$0xff]  ;;  %v244_v14 = vld [vmem:[%s752_s26 + $0x10] sm:$0xff]  ;;  %s240_s7 = scalar_lea.vmem %s806_s3, %s459_s4 }
  0x2b   : > { %484 = vmatprep.subr.mxu0 %v659_v0  ;;  %v243_v15 = vld [vmem:[%s752_s26 + $0x8] sm:$0xff]  ;;  %v242_v16 = vld [vmem:[%s752_s26] sm:$0xff]  ;;  %v241_v17 = vld [vmem:[%s803_s0] sm:$0xff] }
  0x2c   : > { %485 = vmatpush3.msra.mxu0 %v255_v3  ;;  %v460_v18 = vld [vmem:[%s232_s30] ss:$0 sm:$0xff] }
  0x2d   : > { %486 = vmatprep.subr.mxu0 %v659_v0 }
  0x2e   : > { %487 = vmatpush3.msra.mxu0 %v254_v4 }
  0x2f   : > { %488 = vmatprep.subr.mxu0 %v659_v0 }
  0x30   : > { %489 = vmatpush3.msra.mxu0 %v253_v5 }
  0x31   : > { %490 = vmatprep.subr.mxu0 %v659_v0 }
  0x32   : > { %491 = vmatpush3.msra.mxu0 %v252_v6 }
  0x33   : > { %492 = vmatprep.subr.mxu0 %v659_v0 }
  0x34   : > { %493 = vmatpush3.msra.mxu0 %v251_v7 }
  0x35   : > { %494 = vmatprep.subr.mxu0 %v659_v0 }
  0x36   : > { %495 = vmatpush3.msra.mxu0 %v250_v8 }
  0x37   : > { %496 = vmatprep.subr.mxu0 %v659_v0 }
  0x38   : > { %497 = vmatpush3.msra.mxu0 %v249_v9 }
  0x39   : > { %498 = vmatprep.subr.mxu0 %v659_v0 }
  0x3a   : > { %499 = vmatpush3.msra.mxu0 %v248_v10 }
  0x3b   : > { %500 = vmatprep.subr.mxu0 %v659_v0 }
  0x3c   : > { %501 = vmatpush3.msra.mxu0 %v247_v11 }
  0x3d   : > { %502 = vmatprep.subr.mxu0 %v659_v0 }
  0x3e   : > { %503 = vmatpush3.msra.mxu0 %v246_v12 }
  0x3f   : > { %504 = vmatprep.subr.mxu0 %v659_v0 }
  0x40   : > { %505 = vmatpush3.msra.mxu0 %v245_v13 }
  0x41   : > { %506 = vmatprep.subr.mxu0 %v659_v0 }
  0x42   : > { %507 = vmatpush3.msra.mxu0 %v244_v14 }
  0x43   : > { %508 = vmatprep.subr.mxu0 %v659_v0 }
  0x44   : > { %509 = vmatpush3.msra.mxu0 %v243_v15 }
  0x45   : > { %510 = vmatprep.subr.mxu0 %v659_v0 }
  0x46   : > { %511 = vmatpush3.msra.mxu0 %v242_v16 }
  0x47   : > { %513 = vmatmul.mubr.f32.vlgmr.msra.gmra.mxu0 %v241_v17 }
 0x107   : > { %v331_v19 = vpop.f32.mrf.mxu0 }
 0x108   : > { %v332_v20 = vadd.f32 %v460_v18, %v331_v19 }
 0x109   : > { %v514_v21 = vpop.f32.mrf.mxu0 }
 0x10a   : > { %v335_v22 = vmax.f32 %v332_v20, 0.0 }
 0x10c   : > { %336 = vst [vmem:[%s240_s7] sm:$0xff] %v335_v22 }
 0x10d PF: > { %s16_s17 = sadd.s32 1, %s653_s17   ;;  %s810_s12 = smov %s637_s13 }
 0x10e   : > { %p13_p8 = scmp.ge.s32.totalorder %s16_s17, 4   ;;  %s811_s13 = smov %s641_s14 }
 0x10f   : > { %s812_s14 = smov %s730_s24  ;;  %s813_s15 = smov %s649_s16 }
 0x110   : > { %s814_s16 = smov %s816_s19  ;;  %15 = sbr.rel (!%p13_p8) target bundleno = 4 (0x4), region = 78 }
 0x115   :  { %364 = vsyncpa [#allocation3], 1 }
 0x116   :  { %366 = vsyncpa [#allocation3 + $0x1], 1 }

// kernel: crosscoder_forward.3
= control target key start
LH: loop header
LB: loop body
LE: loop exit
PB: predicated region body
PF: predicated region fallthrough
CT: control target
= control target key end

     0   :  { %s328_s2 = inlined_call_operand.vmem [shape: f32[256,128], index: 2, kind: input, shape index: {}]   ;;  %s329_s0 = inlined_call_operand.<no memory space> [shape: f32[1], index: 0, kind: input, shape index: {}]   ;;  %s330_s1 = inlined_call_operand.vmem [shape: f32[8,256], index: 1, kind: input, shape index: {}]   ;;  %s331_s3 = inlined_call_operand.vmem [shape: f32[1,128], index: 3, kind: input, shape index: {}]   ;;  %s332_s4 = inlined_call_operand.vmem [shape: f32[8,128], index: 4, kind: output, shape index: {}]  }
   0x1   :  { %v63_v0 = vld [vmem:[%s328_s2 + $0xf8] sm:$0xff]  ;;  %v62_v2 = vld [vmem:[%s328_s2 + $0xf0] sm:$0xff]  ;;  %v61_v4 = vld [vmem:[%s328_s2 + $0xe8] sm:$0xff]  ;;  %v26_v12 = vstv %s329_s0 }
   0x2   :  { %v47_v1 = vld [vmem:[%s328_s2 + $0x78] sm:$0xff]  ;;  %156 = vmatprep.subr.mxu0 %v63_v0  ;;  %v46_v3 = vld [vmem:[%s328_s2 + $0x70] sm:$0xff]  ;;  %v45_v5 = vld [vmem:[%s328_s2 + $0x68] sm:$0xff] }
   0x3   :  { %157 = vmatpush3.msra.mxu0 %v47_v1  ;;  %v60_v6 = vld [vmem:[%s328_s2 + $0xe0] sm:$0xff]  ;;  %v59_v8 = vld [vmem:[%s328_s2 + $0xd8] sm:$0xff]  ;;  %v58_v10 = vld [vmem:[%s328_s2 + $0xd0] sm:$0xff] }
   0x4   :  { %158 = vmatprep.subr.mxu0 %v62_v2  ;;  %v44_v7 = vld [vmem:[%s328_s2 + $0x60] sm:$0xff]  ;;  %v43_v9 = vld [vmem:[%s328_s2 + $0x58] sm:$0xff]  ;;  %v42_v11 = vld [vmem:[%s328_s2 + $0x50] sm:$0xff] }
   0x5   :  { %159 = vmatpush3.msra.mxu0 %v46_v3  ;;  %v57_v13 = vld [vmem:[%s328_s2 + $0xc8] sm:$0xff]  ;;  %v56_v16 = vld [vmem:[%s328_s2 + $0xc0] sm:$0xff]  ;;  %v55_v18 = vld [vmem:[%s328_s2 + $0xb8] sm:$0xff] }
   0x6   :  { %160 = vmatprep.subr.mxu0 %v61_v4  ;;  %v41_v14 = vld [vmem:[%s328_s2 + $0x48] sm:$0xff]  ;;  %v40_v17 = vld [vmem:[%s328_s2 + $0x40] sm:$0xff]  ;;  %v39_v19 = vld [vmem:[%s328_s2 + $0x38] sm:$0xff] }
   0x7   :  { %161 = vmatpush3.msra.mxu0 %v45_v5  ;;  %v24_v15 = vld [vmem:[%s330_s1 + $0x8] sm:$0xff]  ;;  %v54_v20 = vld [vmem:[%s328_s2 + $0xb0] sm:$0xff]  ;;  %v52_v24 = vld [vmem:[%s328_s2 + $0xa0] sm:$0xff] }
   0x8   :  { %162 = vmatprep.subr.mxu0 %v60_v6  ;;  %vm28_vm0 = vcmp.ge.f32.partialorder %v24_v15, %v26_v12  ;;  %v38_v21 = vld [vmem:[%s328_s2 + $0x30] sm:$0xff]  ;;  %v53_v22 = vld [vmem:[%s328_s2 + $0xa8] sm:$0xff]  ;;  %v36_v25 = vld [vmem:[%s328_s2 + $0x20] sm:$0xff] }
   0x9   :  { %163 = vmatpush3.msra.mxu0 %v44_v7  ;;  %153 = vmatprep.mubr.msk.f32.mxu0 %vm28_vm0, %v24_v15  ;;  %v37_v23 = vld [vmem:[%s328_s2 + $0x28] sm:$0xff]  ;;  %v51_v26 = vld [vmem:[%s328_s2 + $0x98] sm:$0xff]  ;;  %v50_v28 = vld [vmem:[%s328_s2 + $0x90] sm:$0xff] }
   0xa   :  { %164 = vmatprep.subr.mxu0 %v59_v8  ;;  %v35_v27 = vld [vmem:[%s328_s2 + $0x18] sm:$0xff]  ;;  %v34_v29 = vld [vmem:[%s328_s2 + $0x10] sm:$0xff]  ;;  %v49_v30 = vld [vmem:[%s328_s2 + $0x88] sm:$0xff] }
   0xb   :  { %165 = vmatpush3.msra.mxu0 %v43_v9  ;;  %v33_v31 = vld [vmem:[%s328_s2 + $0x8] sm:$0xff]  ;;  %v23_v32 = vld [vmem:[%s330_s1] sm:$0xff] }
   0xc   :  { %166 = vmatprep.subr.mxu0 %v58_v10  ;;  %v48_v33 = vld [vmem:[%s328_s2 + $0x80] sm:$0xff]  ;;  %vm27_vm1 = vcmp.ge.f32.partialorder %v23_v32, %v26_v12 }
   0xd   :  { %167 = vmatpush3.msra.mxu0 %v42_v11  ;;  %v32_v34 = vld [vmem:[%s328_s2] sm:$0xff] }
   0xe   :  { %168 = vmatprep.subr.mxu0 %v57_v13  ;;  %v155_v38 = vld [vmem:[%s331_s3] ss:$0 sm:$0xff] }
   0xf   :  { %169 = vmatpush3.msra.mxu0 %v41_v14 }
  0x10   :  { %170 = vmatprep.subr.mxu0 %v56_v16 }
  0x11   :  { %171 = vmatpush3.msra.mxu0 %v40_v17 }
  0x12   :  { %172 = vmatprep.subr.mxu0 %v55_v18 }
  0x13   :  { %173 = vmatpush3.msra.mxu0 %v39_v19 }
  0x14   :  { %174 = vmatprep.subr.mxu0 %v54_v20 }
  0x15   :  { %175 = vmatpush3.msra.mxu0 %v38_v21 }
  0x16   :  { %176 = vmatprep.subr.mxu0 %v53_v22 }
  0x17   :  { %177 = vmatpush3.msra.mxu0 %v37_v23 }
  0x18   :  { %178 = vmatprep.subr.mxu0 %v52_v24 }
  0x19   :  { %179 = vmatpush3.msra.mxu0 %v36_v25 }
  0x1a   :  { %180 = vmatprep.subr.mxu0 %v51_v26 }
  0x1b   :  { %181 = vmatpush3.msra.mxu0 %v35_v27 }
  0x1c   :  { %182 = vmatprep.subr.mxu0 %v50_v28 }
  0x1d   :  { %183 = vmatpush3.msra.mxu0 %v34_v29 }
  0x1e   :  { %184 = vmatprep.subr.mxu0 %v49_v30 }
  0x1f   :  { %185 = vmatpush3.msra.mxu0 %v33_v31 }
  0x20   :  { %186 = vmatprep.subr.mxu0 %v48_v33 }
  0x21   :  { %187 = vmatpush3.msra.mxu0 %v32_v34 }
  0x22   :  { %154 = vmatmul.mubr.msk.f32.vlgmr.msra.gmra.mxu0 %vm27_vm1, %v23_v32 }
  0xe2   :  { %v188_v35 = vpop.f32.mrf.mxu0 }
  0xe4   :  { %v189_v36 = vpop.f32.mrf.mxu0 }
  0xe5   :  { %v190_v37 = vadd.f32 %v189_v36, %v188_v35 }
  0xe7   :  { %v147_v39 = vadd.f32 %v190_v37, %v155_v38 }
  0xe9   :  { %148 = vst [vmem:[%s332_s4] sm:$0xff] %v147_v39 }

</bundles_post_ra>
